<compile_context>
chip_gen: v7x
topology: tpu7x:2x2x1
jax: 0.10.0
libtpu: 0.0.40
codegen_flags: <defaults>
</compile_context>

<pallas_src>
import jax
import jax.numpy as jnp
from jax.experimental import pallas as pl
from jax.experimental.pallas import tpu as pltpu

_LANE = 128


def _head_kernel(x_ref, w_ref, b_ref, o_ref):
    # x_ref: (C, T)   w_ref: (O, C)   b_ref: (O, 1)   o_ref: (O, T)
    acc = jnp.dot(w_ref[...], x_ref[...], preferred_element_type=jnp.float32)
    z = acc + b_ref[...].astype(jnp.float32)        # lane-broadcast bias
    o_ref[...] = jax.nn.sigmoid(z).astype(o_ref.dtype)


def _round_down(x, m):
    return (x // m) * m


def _cdiv(a, b):
    return -(-a // b)


def _vmem_budget_bytes():
    """Return (tile_budget, vmem_limit) sized per TPU generation."""
    phys = None
    try:
        info = pltpu.get_tpu_info()
        phys = getattr(info, "vmem_capacity_bytes", None)
    except Exception:
        phys = None
    if phys is None:
        # Conservative default that is safe on every generation (v7x floor).
        phys = 64 * 1024 * 1024
    if phys <= 64 * 1024 * 1024:
        # v7x: 64 MiB per TensorCore -> leave headroom for compiler scratch.
        return 40 * 1024 * 1024, 48 * 1024 * 1024
    # v5e / v6e (128 MiB physical): raise the scoped limit well above the
    # 16/32 MiB defaults so large-C features still get T >= 2048.
    return 72 * 1024 * 1024, 96 * 1024 * 1024


def _pick_spatial_tile(HW, C, O, N, in_itemsize, out_itemsize, tile_budget,
                       max_tile=8192):
    """Largest lane-multiple spatial tile fitting the VMEM budget.

    Live VMEM per step ~= 2*in_itemsize*C*T (double-buffered input)
                        + 2*out_itemsize*O*T (double-buffered output)
                        + resident weight/bias.
    """
    if HW <= _LANE:
        return HW  # full-extent block (allowed even when not a lane multiple)

    per_t = 2 * in_itemsize * C + 2 * out_itemsize * O
    resident = 2 * in_itemsize * (O * C + O)
    t = max((tile_budget - resident) // per_t, _LANE)
    t_cap = max(_LANE, _round_down(HW, _LANE))      # keep block <= array dim
    t = _round_down(min(t, max_tile, t_cap), _LANE)
    t = max(t, _LANE)

    # Keep >= ~8 grid steps so v7x's 2 TensorCores both get work and the
    # pipeliner can overlap DMAs, but never drop below 512 lanes (HBM
    # roofline cliff below that).
    min_steps, min_tile = 8, 4 * _LANE
    while t > min_tile and N * _cdiv(HW, t) < min_steps:
        t = max(min_tile, _round_down(t // 2, _LANE))
    return t


def instance_segmentation_head(x_nchw, weight, bias, *, cast_inputs_to_bf16=False):
    """sigmoid(1x1-conv(x)).

    x_nchw: (N, C, H, W)
    weight: (num_instances, C)   (1x1 conv weight with k-dims squeezed)
    bias:   (num_instances,)
    returns (N, num_instances, H, W) in x_nchw.dtype
    """
    N, C, H, W = x_nchw.shape
    O = weight.shape[0]
    HW = H * W

    # Free reshape of contiguous NCHW -> (N, C, H*W).  No transposes, no pad:
    # any spatial tail is handled by the cdiv grid's masked partial blocks.
    x3 = x_nchw.reshape(N, C, HW)
    w2 = weight
    if cast_inputs_to_bf16:
        # Numerics-approved fast path only: halves the dominant HBM read.
        x3 = x3.astype(jnp.bfloat16)
        w2 = w2.astype(jnp.bfloat16)
    b_col = bias.reshape(O, 1).astype(jnp.float32)

    in_itemsize = jnp.dtype(x3.dtype).itemsize
    out_itemsize = jnp.dtype(x_nchw.dtype).itemsize

    tile_budget, vmem_limit = _vmem_budget_bytes()
    T = _pick_spatial_tile(HW, C, O, N, in_itemsize, out_itemsize, tile_budget)
    grid = (N, _cdiv(HW, T))

    # Advisory cost estimate so XLA schedules around the (mem-bound) kernel.
    cost = pl.CostEstimate(
        flops=2 * N * HW * C * O,
        transcendentals=N * HW * O,
        bytes_accessed=(in_itemsize * (N * C * HW + O * C) + 4 * O
                        + out_itemsize * N * O * HW),
    )

    out3 = pl.pallas_call(
        _head_kernel,
        out_shape=jax.ShapeDtypeStruct((N, O, HW), x_nchw.dtype),
        grid_spec=pltpu.PrefetchScalarGridSpec(
            num_scalar_prefetch=0,
            grid=grid,
            in_specs=[
                # Batch dim squeezed inside the kernel; spatial in lanes.
                pl.BlockSpec((None, C, T), lambda n, s: (n, 0, s)),
                pl.BlockSpec((O, C), lambda n, s: (0, 0)),   # resident weight
                pl.BlockSpec((O, 1), lambda n, s: (0, 0)),   # resident bias
            ],
            out_specs=pl.BlockSpec((None, O, T), lambda n, s: (n, 0, s)),
        ),
        compiler_params=pltpu.CompilerParams(
            dimension_semantics=("parallel", "parallel"),
            vmem_limit_bytes=vmem_limit,
        ),
        cost_estimate=cost,
    )(x3, w2, b_col)

    return out3.reshape(N, O, H, W)


if __name__ == "__main__":
    num_instances = 5

    def run_case(N, C, H, W, key):
        kx, kw, kb = jax.random.split(key, 3)
        x = jax.random.normal(kx, (N, C, H, W), dtype=jnp.float32)
        weight = jax.random.normal(kw, (num_instances, C), dtype=jnp.float32) * 0.05
        bias = jax.random.normal(kb, (num_instances,), dtype=jnp.float32) * 0.05

        out = jax.block_until_ready(instance_segmentation_head(x, weight, bias))

        ref = jax.nn.sigmoid(
            jnp.einsum("nchw,oc->nohw", x, weight) + bias[None, :, None, None])
        assert out.shape == (N, num_instances, H, W)
        assert jnp.allclose(out, ref, atol=1e-5, rtol=1e-5)

    key = jax.random.PRNGKey(0)
    k0, k1, k2 = jax.random.split(key, 3)
    run_case(2, 32, 16, 16, k0)   # lane-aligned spatial extent (HW = 256)
    run_case(2, 32, 13, 13, k1)   # HW = 169: masked tail-block path
    run_case(1, 32, 9, 9, k2)     # HW = 81 < 128: full-extent block
    print("KERNEL_OK")
</pallas_src>

<mosaic_0001>
module attributes {stable_mosaic.version = 11 : i64} {
  func.func @_head_kernel(%arg0: i32, %arg1: i32, %arg2: memref<1x32x256xf32, #tpu.memory_space<vmem>>, %arg3: memref<5x32xf32, #tpu.memory_space<vmem>>, %arg4: memref<5x1xf32, #tpu.memory_space<vmem>>, %arg5: memref<1x5x256xf32, #tpu.memory_space<vmem>>) attributes {dimension_semantics = [#tpu.dimension_semantics<parallel>, #tpu.dimension_semantics<parallel>], iteration_bounds = array<i64: 2, 1>, scalar_prefetch = 0 : i64, scratch_operands = 0 : i64, tpu.core_type = #tpu.core_type<tc>, window_params = [{transform_indices = @transform_0, window_bounds = array<i64: 1, 32, 256>}, {pipeline_mode = #tpu.pipeline_mode<synchronous>, transform_indices = @transform_1, window_bounds = array<i64: 5, 32>}, {pipeline_mode = #tpu.pipeline_mode<synchronous>, transform_indices = @transform_2, window_bounds = array<i64: 5, 1>}, {transform_indices = @transform_3, window_bounds = array<i64: 1, 5, 256>}]} {
    %c0 = arith.constant 0 : index
    %c0_0 = arith.constant 0 : index
    %0 = vector.load %arg3[%c0, %c0_0] : memref<5x32xf32, #tpu.memory_space<vmem>>, vector<5x32xf32>
    %c0_1 = arith.constant 0 : index
    %c0_2 = arith.constant 0 : index
    %c0_3 = arith.constant 0 : index
    %1 = vector.load %arg2[%c0_1, %c0_2, %c0_3] : memref<1x32x256xf32, #tpu.memory_space<vmem>>, vector<1x32x256xf32>
    %2 = vector.shape_cast %1 : vector<1x32x256xf32> to vector<32x256xf32>
    %cst = arith.constant dense<0.000000e+00> : vector<5x256xf32>
    %3 = tpu.matmul %0, %2, %cst {dimension_numbers = #tpu.dot_dimension_numbers<[1], [0], [0], [1], [0, 0, 1, 1], [], []>} : vector<5x32xf32>, vector<32x256xf32>, vector<5x256xf32> -> vector<5x256xf32>
    %c0_4 = arith.constant 0 : index
    %c0_5 = arith.constant 0 : index
    %4 = vector.load %arg4[%c0_4, %c0_5] : memref<5x1xf32, #tpu.memory_space<vmem>>, vector<5x1xf32>
    %5 = vector.broadcast %4 : vector<5x1xf32> to vector<5x256xf32>
    %6 = arith.addf %3, %5 : vector<5x256xf32>
    %7 = arith.negf %6 : vector<5x256xf32>
    %8 = math.exp %7 : vector<5x256xf32>
    %cst_6 = arith.constant 1.000000e+00 : f32
    %9 = vector.broadcast %cst_6 : f32 to vector<5x256xf32>
    %10 = arith.addf %9, %8 : vector<5x256xf32>
    %11 = arith.divf %9, %10 : vector<5x256xf32>
    %c0_7 = arith.constant 0 : index
    %c0_8 = arith.constant 0 : index
    %c0_9 = arith.constant 0 : index
    %12 = vector.load %arg5[%c0_7, %c0_8, %c0_9] : memref<1x5x256xf32, #tpu.memory_space<vmem>>, vector<1x5x256xf32>
    %13 = vector.shape_cast %12 : vector<1x5x256xf32> to vector<5x256xf32>
    %14 = vector.shape_cast %11 : vector<5x256xf32> to vector<1x5x256xf32>
    tpu.vector_store %arg5[%c0_7, %c0_8, %c0_9], %14 {strides = array<i32>} : memref<1x5x256xf32, #tpu.memory_space<vmem>>, vector<1x5x256xf32>,
    return
  }
  func.func @transform_0(%arg0: i32, %arg1: i32) -> (i32, i32, i32) {
    %c0_i32 = arith.constant 0 : i32
    %c0_i32_0 = arith.constant 0 : i32
    return %arg0, %c0_i32, %arg1 : i32, i32, i32
  }
  func.func @transform_1(%arg0: i32, %arg1: i32) -> (i32, i32) {
    %c0_i32 = arith.constant 0 : i32
    %c0_i32_0 = arith.constant 0 : i32
    %c0_i32_1 = arith.constant 0 : i32
    return %c0_i32, %c0_i32_0 : i32, i32
  }
  func.func @transform_2(%arg0: i32, %arg1: i32) -> (i32, i32) {
    %c0_i32 = arith.constant 0 : i32
    %c0_i32_0 = arith.constant 0 : i32
    %c0_i32_1 = arith.constant 0 : i32
    return %c0_i32, %c0_i32_0 : i32, i32
  }
  func.func @transform_3(%arg0: i32, %arg1: i32) -> (i32, i32, i32) {
    %c0_i32 = arith.constant 0 : i32
    %c0_i32_0 = arith.constant 0 : i32
    return %arg0, %c0_i32, %arg1 : i32, i32, i32
  }
}

</mosaic_0001>

<bundles_post_ra>
// kernel: tpu_custom_call.1
= control target key start
LH: loop header
LB: loop body
LE: loop exit
PB: predicated region body
PF: predicated region fallthrough
CT: control target
= control target key end

     0   :  { %8 = vsyncpa [#allocation3], 0  ;;  %s749_s0 = inlined_call_operand.hbm [shape: f32[2,32,256], index: 0, kind: input, shape index: {}]   ;;  %s750_s1 = inlined_call_operand.vmem [shape: f32[5,32], index: 1, kind: input, shape index: {}]   ;;  %s751_s2 = inlined_call_operand.vmem [shape: f32[5,1], index: 2, kind: input, shape index: {}]   ;;  %s752_s3 = inlined_call_operand.vmem [shape: f32[2,5,256], index: 3, kind: output, shape index: {}]  }
   0x1   :  { %10 = vsyncpa [#allocation3 + $0x1], 0  ;;  %s619_s12 = smov 0   ;;  %s621_s13 = smov 0  }
   0x2   :  { %s623_s14 = smov 0   ;;  %s625_s15 = smov 0  }
   0x3   :  { %s627_s16 = smov 0   ;;  %s629_s17 = smov 0  }
   0x4 LB: > { %s418_s18 = sadd.s32 4294967295, %s592_s17   ;;  %s28_s19 = sadd.s32 1, %s588_s16  ;;  %s592_s17 = sphi %s629_s17, %s16_s17   ;;  %s588_s16 = sphi %s627_s16, %s760_s16   ;;  %s584_s15 = sphi %s625_s15, %s759_s15   ;;  %s580_s14 = sphi %s623_s14, %s758_s14   ;;  %s576_s13 = sphi %s621_s13, %s757_s13   ;;  %s572_s12 = sphi %s619_s12, %s756_s12  }
   0x5   : > { %p30_p0 = scmp.ge.s32.totalorder %s28_s19, 2  ;;  %s37_s20 = sadd.s32 1, %s580_s14 }
   0x6   : > { %p44_p1 = scmp.ne.s32.totalorder %s580_s14, %s576_s13  ;;  %p45_p2 = scmp.eq.s32.totalorder %s592_s17, 0 }
   0x7   : > { %s762_s19 = smov (%p30_p0, %s28_s19), 0  ;;  %p50_p4 = scmp.ne.s32.totalorder %s576_s13, %s572_s12 }
   0x8   : > { %p655_p3 = por %p45_p2, %p44_p1  ;;  %s32_s22 = ssub.s32 %s588_s16, %s762_s19 }
   0x9   : > { %p51_p5 = scmp.eq.s32.totalorder %s418_s18, 0  ;;  %p35_p6 = scmp.eq.s32.totalorder %s32_s22, 0 }
   0xa   : > { %p450_p8 = scmp.lt.s32.totalorder %s592_s17, 2  ;;  %s150_s25 = sand.u32 1, %s580_s14  }
   0xb   : > { %p662_p7 = por %p51_p5, %p50_p4  ;;  %s434_s26 = sshll.u32 %s588_s16, 10 }
   0xc   : > { %s668_s24 = scalar_select %p35_p6, %s580_s14, %s37_s20  }
   0xd   : > { %s422_s27 = sshll.u32 %s150_s25, 6  ;;  %s675_s30 = scalar_lea.hbm %s749_s0, %s434_s26 }
   0xe   : > { %s154_s4 = scalar_lea.vmem [#allocation2], %s422_s27  ;;  %p679_p9 = pnand %p450_p8, %p655_p3 }
   0xf   : > { %s163_s5 = sshll.u32 %s154_s4, 4  ;;  %s685_s7 = scalar_lea.sflag [#allocation3], %s150_s25  ;;  %s683_s5 = int_to_ptr.vmem [resolvable:$true] %s163_s5 }
  0x10   : > { %s512_s8 = scalar_lea.hbm %s675_s30, 1024  ;;  %p514_p11 = pneg %p679_p9 }
  0x11   : > { %p513_p10 = scmp.ne.s32.totalorder %s675_s30, %s512_s8  ;;  %s517_s11 = scalar_lea.hbm %s749_s0, 2048 }
  0x12   : > { %p518_p0 = scmp.lt.u32.totalorder %s675_s30, %s749_s0  ;;  %p519_p1 = scmp.lt.u32.totalorder %s517_s11, %s512_s8 }
  0x13   : > { %p515_p12 = pnand %p514_p11, %p513_p10  ;;  %p521_p3 = scmp.lt.u32.totalorder %s512_s8, %s675_s30 }
  0x14   : > { %p520_p2 = por %p519_p1, %p518_p0 }
  0x15   : > { %p516_p13 = pneg %p515_p12 }
  0x16   : > { %p522_p4 = por %p521_p3, %p520_p2 }
  0x18   : > { %p523_p5 = pnand %p522_p4, %p516_p13 }
  0x1a   : > { %526 = shalt.err (!%p523_p5)
}
  0x1b   : > { %s527_s20 = scalar_lea.vmem %s683_s5, 1024  ;;  %s594_s21 = smov [#allocation2]  }
  0x1c   : > { %p528_p6 = scmp.ne.s32.totalorder %s683_s5, %s527_s20  ;;  %s532_s22 = sshll.u32 %s594_s21, 4  ;;  %s533_s22 = int_to_ptr.vmem [resolvable:$false] %s532_s22 }
  0x1d   : > { %s534_s25 = scalar_lea.vmem %s533_s22, 2048  ;;  %p535_p12 = scmp.lt.s32.totalorder %s683_s5, %s533_s22 }
  0x1e   : > { %p530_p8 = pnand %p528_p6, %p514_p11  ;;  %p536_p0 = scmp.lt.s32.totalorder %s534_s25, %s527_s20 }
  0x20   : > { %p531_p10 = pneg %p530_p8  ;;  %p537_p1 = por %p536_p0, %p535_p12 }
  0x22   : > { %p538_p2 = pnand %p537_p1, %p531_p10 }
  0x24   : > { %541 = shalt.err (!%p538_p2)
}
  0x25   : > { %s595_s26 = smov 256   ;;  %s596_s27 = smov 16  }
  0x26   : > { %449 = dma.hbm_to_vmem [thread:$0]  (!%p679_p9), %s675_s30, 1024, %s683_s5, %s685_s7, %s595_s26, %s595_s26, %s596_s27  }
  0x27   : > { %p425_p11 = scmp.ge.s32.totalorder %s592_s17, 1  ;;  %p171_p13 = scmp.lt.s32.totalorder %s592_s17, 3 }
  0x29   : > { %p172_p3 = pnand %p425_p11, %p171_p13 }
  0x2a   : > { %s177_s28 = sand.u32 (!%p172_p3), 1, %s576_s13  }
  0x2b   : > { %175 = sbr.rel (%p172_p3) target bundleno = 304 (0x130), region = 32  ;;  %s426_s29 = sshll.u32 (!%p172_p3), %s177_s28, 6 }
  0x2c   : > { %s178_s4 = scalar_lea.sflag (!%p172_p3), [#allocation3], %s177_s28  ;;  %s181_s8 = scalar_lea.vmem (!%p172_p3), [#allocation2], %s426_s29 }
  0x32   : > { %567 = dma.done.wait (%p662_p7), %s178_s4, 1024  }
  0x33   : > { %569 = vsyncadd (%p662_p7), %s178_s4, 4294966272  ;;  %v597_v0 = vmov 0.0   ;;  %v598_v1 = vmov 0   ;;  %v221_v2 = vld [vmem:[%s181_s8 + $0x8] sm:$0xff]  ;;  %v223_v3 = vld [vmem:[%s181_s8 + $0x18] sm:$0xff]  ;;  %vm234_vm0 = vcmask 261120  }
  0x34   : > { %302 = vmatprep.mubr.f32.mxu0 %v597_v0  ;;  %503 = vset.pattern.permute.xlu0 %v598_v1  ;;  %v220_v4 = vld [vmem:[%s181_s8] sm:$0xff]  ;;  %v436_v5 = vpack.c.bf16 %v223_v3, %v221_v2  ;;  %v222_v6 = vld [vmem:[%s181_s8 + $0x10] sm:$0xff]  ;;  %v225_v7 = vld [vmem:[%s181_s8 + $0x28] sm:$0xff]  ;;  %p210_p7 = scmp.lt.s32.totalorder %s584_s15, 1 }
  0x35   : > { %v227_v8 = vld [vmem:[%s181_s8 + $0x38] sm:$0xff]  ;;  %v438_v9 = vpack.c.bf16 %v222_v6, %v220_v4  ;;  %v224_v11 = vld [vmem:[%s181_s8 + $0x20] sm:$0xff]  ;;  %v226_v12 = vld [vmem:[%s181_s8 + $0x30] sm:$0xff] }
  0x36   : > { %v440_v10 = vpack.c.bf16 %v227_v8, %v225_v7  ;;  %437 = vmatprep.subr.bf16.mxu0 %v436_v5  ;;  %v228_v13 = vld [vmem:[%s751_s2] sm:$0x1f]  ;;  %v442_v14 = vpack.c.bf16 %v226_v12, %v224_v11  ;;  %s764_s15 = smov (!%p210_p7, %s584_s15), 1 }
  0x37   : > { %439 = vmatpush1.bf16.msra.mxu0 %v438_v9  ;;  %231 = vperm.xlu0 %503, %v228_v13   ;;  %v219_v15 = vld [vmem:[%s750_s1] sm:$0x1f]  ;;  %s435_s7 = sshll.u32 %s764_s15, 4 }
  0x38   : > { %441 = vmatprep.subr.bf16.mxu0 %v440_v10  ;;  %s217_s11 = scalar_lea.vmem %s752_s3, %s435_s7 }
  0x3b   : > { %443 = vmatpush1.bf16.msra.mxu0 %v442_v14 }
  0x3e   : > { %429 = vmatmul.mubr.msk.f32.vlgmr.msra.gmra.mrb[0].mxu0 %vm234_vm0, %v219_v15 }
  0xb6   : > { %v232_v16 = vpop.permute.xlu0 %231 }
 0x111   : > { %v304_v17 = vpop.f32.mrb[0].mxu0 }
 0x112   : > { %v305_v18 = vadd.f32 %v304_v17, %v232_v16  ;;  %v306_v19 = vpop.f32.mrb[1].mxu0 }
 0x113   : > { %v307_v20 = vadd.f32 %v306_v19, %v232_v16 }
 0x114   : > { %v430_v21 = vmul.f32 -1.442695, %v305_v18 }
 0x115   : > { %v431_v22 = vmul.f32 -1.442695, %v307_v20 }
 0x116   : > { %504 = vpow2.f32 %v430_v21 }
 0x117   : > { %506 = vpow2.f32 %v431_v22 }
 0x120   : > { %v505_v23 = vpop.eup %504 }
 0x121   : > { %v507_v24 = vpop.eup %506  ;;  %v315_v25 = vadd.f32 1.0, %v505_v23 }
 0x122   : > { %v316_v26 = vadd.f32 1.0, %v507_v24 }
 0x123   : > { %508 = vrcp.f32 %v315_v25 }
 0x124   : > { %510 = vrcp.f32 %v316_v26 }
 0x12d   : > { %v509_v27 = vpop.eup %508 }
 0x12e   : > { %v511_v28 = vpop.eup %510  ;;  %321 = vst [vmem:[%s217_s11] sm:$0x1f] %v509_v27 }
 0x12f   : > { %322 = vst [vmem:[%s217_s11 + $0x8] sm:$0x1f] %v511_v28 }
 0x130 PF: > { %s16_s17 = sadd.s32 1, %s592_s17   ;;  %s756_s12 = smov %s576_s13 }
 0x131   : > { %p13_p9 = scmp.ge.s32.totalorder %s16_s17, 4   ;;  %s757_s13 = smov %s580_s14 }
 0x132   : > { %s758_s14 = smov %s668_s24  ;;  %s759_s15 = smov %s588_s16 }
 0x133   : > { %s760_s16 = smov %s762_s19  ;;  %15 = sbr.rel (!%p13_p9) target bundleno = 4 (0x4), region = 72 }
 0x13a   :  { %353 = vsyncpa [#allocation3], 1 }
 0x13b   :  { %355 = vsyncpa [#allocation3 + $0x1], 1 }

</bundles_post_ra>
